<compile_context>
chip_gen: v5e
topology: v5e:2x2
jax: 0.10.0
libtpu: 0.0.40
codegen_flags: <defaults>
</compile_context>

<pallas_src>
import functools

import numpy as np
import jax
import jax.numpy as jnp
from jax.experimental import pallas as pl
from jax.experimental.pallas import tpu as pltpu


def _round_up(x, m):
    return (x + m - 1) // m * m


def _hann_window_np(n_fft):
    # torch.hann_window(n_fft) (periodic): 0.5 - 0.5*cos(2*pi*m/n_fft)
    m = np.arange(n_fft, dtype=np.float64)
    return 0.5 - 0.5 * np.cos(2.0 * np.pi * m / n_fft)


def _windowed_dft_basis(n_fft, bins_pad):
    # (n_fft, 2*bins_pad): [:, :bins_pad] = hann*cos, [:, bins_pad:] = -hann*sin.
    n = np.arange(n_fft, dtype=np.float64)[:, None]
    k = np.arange(bins_pad, dtype=np.float64)[None, :]
    ang = 2.0 * np.pi * n * k / n_fft
    win = _hann_window_np(n_fft)[:, None]
    basis = np.concatenate([win * np.cos(ang), -win * np.sin(ang)], axis=1)
    return jnp.asarray(basis, dtype=jnp.float32)


# ------------------------------ Pallas kernel --------------------------------

def stft_dft_kernel(x_ref, w_ref, o_ref, *, n_hop, n_fft, fpb, b_pad):
    """One frame-block of the STFT as MXU matmuls against the windowed DFT basis.

    x_ref: (n_chunks_pad * b_pad, n_hop)   hop-sized audio chunks, chunk-major,
                                           fully VMEM-resident (constant index_map).
    w_ref: (n_fft, 2 * bins_pad)           Hann-windowed DFT basis [cos | -sin].
    o_ref: (fpb * b_pad, 2 * bins_pad)     lane-dense output tile for this block.
    """
    fb = pl.program_id(0)
    r_chunks = n_fft // n_hop              # hop-chunks per frame
    rows = fpb * b_pad

    # Frame t = fb*fpb + j is the concatenation over r of hop-chunks t + r.
    # For the whole block and a fixed r, the needed chunks form the contiguous,
    # sublane-aligned row range [(fb*fpb + r)*b_pad, (fb*fpb + r + fpb)*b_pad),
    # so the windowed DFT splits into r_chunks matmuls accumulated in vregs.
    acc = None
    for r in range(r_chunks):
        start = pl.multiple_of((fb * fpb + r) * b_pad, b_pad)
        piece = x_ref[pl.ds(start, rows), :]                 # (rows, n_hop)
        w_r = w_ref[r * n_hop:(r + 1) * n_hop, :]            # (n_hop, 2*bins_pad)
        term = jnp.dot(piece, w_r, preferred_element_type=jnp.float32)
        acc = term if acc is None else acc + term
    o_ref[...] = acc


# ------------------------------ Wrapper ---------------------------------------

def pallas_stft(audio, *, n_fft, n_hop, frames_per_block=4):
    """torch.stft-compatible STFT (center=False, onesided, hann window).

    audio:   (nb_samples, nb_channels, nb_timesteps) float32
    returns: (nb_samples, nb_channels, n_fft//2 + 1, nb_frames, 2) float32
    """
    assert n_fft % n_hop == 0, "this kernel assumes n_hop divides n_fft"
    S, C, T = audio.shape
    assert T >= n_fft, "center=False requires nb_timesteps >= n_fft"

    n_bins = n_fft // 2 + 1
    bins_pad = _round_up(n_bins, 128)       # lane-dense real/imag halves
    k_out = 2 * bins_pad
    n_frames = 1 + (T - n_fft) // n_hop
    r_chunks = n_fft // n_hop

    B = S * C
    b_pad = _round_up(B, 8)                 # sublane-aligned batch rows
    fpb = max(1, min(frames_per_block, n_frames))
    num_blocks = -(-n_frames // fpb)
    n_frames_pad = num_blocks * fpb
    n_chunks_pad = n_frames_pad - 1 + r_chunks

    # Chunk the audio by hop, chunk-major with batch inside:
    # row c*b_pad + b of `chunks` holds samples [c*n_hop, (c+1)*n_hop) of batch b.
    x = audio.reshape(B, T)
    need_t = n_chunks_pad * n_hop
    x = jnp.pad(x, ((0, b_pad - B), (0, max(0, need_t - T))))[:, :need_t]
    chunks = jnp.transpose(x.reshape(b_pad, n_chunks_pad, n_hop), (1, 0, 2))
    chunks = chunks.reshape(n_chunks_pad * b_pad, n_hop)

    basis = _windowed_dft_basis(n_fft, bins_pad)            # (n_fft, k_out)

    kernel = functools.partial(stft_dft_kernel, n_hop=n_hop, n_fft=n_fft,
                               fpb=fpb, b_pad=b_pad)
    out2d = pl.pallas_call(
        kernel,
        out_shape=jax.ShapeDtypeStruct((n_frames_pad * b_pad, k_out), jnp.float32),
        grid=(num_blocks,),
        in_specs=[
            pl.BlockSpec((n_chunks_pad * b_pad, n_hop), lambda fb: (0, 0)),
            pl.BlockSpec((n_fft, k_out), lambda fb: (0, 0)),
        ],
        out_specs=pl.BlockSpec((fpb * b_pad, k_out), lambda fb: (fb, 0)),
        compiler_params=pltpu.CompilerParams(dimension_semantics=("parallel",)),
    )(chunks, basis)

    # Layout glue back to the module's output convention (plain JAX, tiny).
    out = out2d[:n_frames * b_pad].reshape(n_frames, b_pad, k_out)[:, :B]
    real = out[..., :n_bins]
    imag = out[..., bins_pad:bins_pad + n_bins]
    stft_f = jnp.stack([real, imag], axis=-1)               # (frames, B, bins, 2)
    stft_f = stft_f.reshape(n_frames, S, C, n_bins, 2)
    return jnp.transpose(stft_f, (1, 2, 3, 0, 4))           # (S, C, bins, frames, 2)


# ------------------------------ Pure-JAX reference ----------------------------

def reference_stft(audio, *, n_fft, n_hop):
    # Explicit framing + jnp.fft.rfft; only used to validate the Pallas kernel.
    S, C, T = audio.shape
    x = audio.reshape(S * C, T)
    n_frames = 1 + (T - n_fft) // n_hop
    idx = jnp.arange(n_frames)[:, None] * n_hop + jnp.arange(n_fft)[None, :]
    win = jnp.asarray(_hann_window_np(n_fft), jnp.float32)
    frames = x[:, idx] * win[None, None, :]
    spec = jnp.fft.rfft(frames, axis=-1)                    # (S*C, frames, bins)
    out = jnp.stack([spec.real, spec.imag], axis=-1)
    out = out.reshape(S, C, n_frames, n_fft // 2 + 1, 2)
    return jnp.transpose(out, (0, 1, 3, 2, 4)).astype(jnp.float32)


# ------------------------------ Main -------------------------------------------

if __name__ == "__main__":
    # Small, module-consistent shapes: n_fft=128 -> 65 bins, hop=32,
    # 2 samples x 4 channels, 352 timesteps -> 8 frames (center=False).
    n_fft, n_hop = 128, 32
    nb_samples, nb_channels = 2, 4
    nb_frames = 8
    nb_timesteps = n_fft + (nb_frames - 1) * n_hop          # 352

    key = jax.random.PRNGKey(0)
    audio = jax.random.normal(key, (nb_samples, nb_channels, nb_timesteps), jnp.float32)

    stft = jax.jit(functools.partial(pallas_stft, n_fft=n_fft, n_hop=n_hop,
                                     frames_per_block=4))
    out = jax.block_until_ready(stft(audio))

    ref = reference_stft(audio, n_fft=n_fft, n_hop=n_hop)

    assert out.shape == (nb_samples, nb_channels, n_fft // 2 + 1, nb_frames, 2), out.shape
    # Tolerance sized for MXU f32 accumulation vs. the FFT reference
    # (spectral values here are O(10); a wrong transform would be O(10) off).
    max_err = float(jnp.max(jnp.abs(out - ref)))
    assert jnp.allclose(out, ref, atol=5e-2, rtol=5e-3), max_err
    print("KERNEL_OK")
</pallas_src>

<mosaic_0001>
module attributes {stable_mosaic.version = 11 : i64} {
  func.func @stft_dft_kernel(%arg0: i32, %arg1: memref<88x32xf32, #tpu.memory_space<vmem>>, %arg2: memref<128x256xf32, #tpu.memory_space<vmem>>, %arg3: memref<32x256xf32, #tpu.memory_space<vmem>>) attributes {dimension_semantics = [#tpu.dimension_semantics<parallel>], iteration_bounds = array<i64: 2>, scalar_prefetch = 0 : i64, scratch_operands = 0 : i64, tpu.core_type = #tpu.core_type<tc>, window_params = [{pipeline_mode = #tpu.pipeline_mode<synchronous>, transform_indices = @transform_0, window_bounds = array<i64: 88, 32>}, {pipeline_mode = #tpu.pipeline_mode<synchronous>, transform_indices = @transform_1, window_bounds = array<i64: 128, 256>}, {transform_indices = @transform_2, window_bounds = array<i64: 32, 256>}]} {
    %c4_i32 = arith.constant 4 : i32
    %0 = arith.muli %arg0, %c4_i32 : i32
    %c0_i32 = arith.constant 0 : i32
    %1 = arith.addi %0, %c0_i32 : i32
    %c8_i32 = arith.constant 8 : i32
    %2 = arith.muli %1, %c8_i32 : i32
    %3 = tpu.assume_multiple %2, 8 : i32
    %4 = arith.index_cast %3 : i32 to index
    %c0 = arith.constant 0 : index
    %5 = vector.load %arg1[%4, %c0] : memref<88x32xf32, #tpu.memory_space<vmem>>, vector<32x32xf32>
    %c0_0 = arith.constant 0 : index
    %c0_1 = arith.constant 0 : index
    %6 = vector.load %arg2[%c0_0, %c0_1] : memref<128x256xf32, #tpu.memory_space<vmem>>, vector<32x256xf32>
    %cst = arith.constant dense<0.000000e+00> : vector<32x256xf32>
    %7 = tpu.matmul %5, %6, %cst {dimension_numbers = #tpu.dot_dimension_numbers<[1], [0], [0], [1], [0, 0, 1, 1], [], []>} : vector<32x32xf32>, vector<32x256xf32>, vector<32x256xf32> -> vector<32x256xf32>
    %c4_i32_2 = arith.constant 4 : i32
    %8 = arith.muli %arg0, %c4_i32_2 : i32
    %c1_i32 = arith.constant 1 : i32
    %9 = arith.addi %8, %c1_i32 : i32
    %c8_i32_3 = arith.constant 8 : i32
    %10 = arith.muli %9, %c8_i32_3 : i32
    %11 = tpu.assume_multiple %10, 8 : i32
    %12 = arith.index_cast %11 : i32 to index
    %c0_4 = arith.constant 0 : index
    %13 = vector.load %arg1[%12, %c0_4] : memref<88x32xf32, #tpu.memory_space<vmem>>, vector<32x32xf32>
    %c32 = arith.constant 32 : index
    %c0_5 = arith.constant 0 : index
    %14 = vector.load %arg2[%c32, %c0_5] : memref<128x256xf32, #tpu.memory_space<vmem>>, vector<32x256xf32>
    %cst_6 = arith.constant dense<0.000000e+00> : vector<32x256xf32>
    %15 = tpu.matmul %13, %14, %cst_6 {dimension_numbers = #tpu.dot_dimension_numbers<[1], [0], [0], [1], [0, 0, 1, 1], [], []>} : vector<32x32xf32>, vector<32x256xf32>, vector<32x256xf32> -> vector<32x256xf32>
    %16 = arith.addf %7, %15 : vector<32x256xf32>
    %c4_i32_7 = arith.constant 4 : i32
    %17 = arith.muli %arg0, %c4_i32_7 : i32
    %c2_i32 = arith.constant 2 : i32
    %18 = arith.addi %17, %c2_i32 : i32
    %c8_i32_8 = arith.constant 8 : i32
    %19 = arith.muli %18, %c8_i32_8 : i32
    %20 = tpu.assume_multiple %19, 8 : i32
    %21 = arith.index_cast %20 : i32 to index
    %c0_9 = arith.constant 0 : index
    %22 = vector.load %arg1[%21, %c0_9] : memref<88x32xf32, #tpu.memory_space<vmem>>, vector<32x32xf32>
    %c64 = arith.constant 64 : index
    %c0_10 = arith.constant 0 : index
    %23 = vector.load %arg2[%c64, %c0_10] : memref<128x256xf32, #tpu.memory_space<vmem>>, vector<32x256xf32>
    %cst_11 = arith.constant dense<0.000000e+00> : vector<32x256xf32>
    %24 = tpu.matmul %22, %23, %cst_11 {dimension_numbers = #tpu.dot_dimension_numbers<[1], [0], [0], [1], [0, 0, 1, 1], [], []>} : vector<32x32xf32>, vector<32x256xf32>, vector<32x256xf32> -> vector<32x256xf32>
    %25 = arith.addf %16, %24 : vector<32x256xf32>
    %c4_i32_12 = arith.constant 4 : i32
    %26 = arith.muli %arg0, %c4_i32_12 : i32
    %c3_i32 = arith.constant 3 : i32
    %27 = arith.addi %26, %c3_i32 : i32
    %c8_i32_13 = arith.constant 8 : i32
    %28 = arith.muli %27, %c8_i32_13 : i32
    %29 = tpu.assume_multiple %28, 8 : i32
    %30 = arith.index_cast %29 : i32 to index
    %c0_14 = arith.constant 0 : index
    %31 = vector.load %arg1[%30, %c0_14] : memref<88x32xf32, #tpu.memory_space<vmem>>, vector<32x32xf32>
    %c96 = arith.constant 96 : index
    %c0_15 = arith.constant 0 : index
    %32 = vector.load %arg2[%c96, %c0_15] : memref<128x256xf32, #tpu.memory_space<vmem>>, vector<32x256xf32>
    %cst_16 = arith.constant dense<0.000000e+00> : vector<32x256xf32>
    %33 = tpu.matmul %31, %32, %cst_16 {dimension_numbers = #tpu.dot_dimension_numbers<[1], [0], [0], [1], [0, 0, 1, 1], [], []>} : vector<32x32xf32>, vector<32x256xf32>, vector<32x256xf32> -> vector<32x256xf32>
    %34 = arith.addf %25, %33 : vector<32x256xf32>
    %c0_17 = arith.constant 0 : index
    %c0_18 = arith.constant 0 : index
    %35 = vector.load %arg3[%c0_17, %c0_18] : memref<32x256xf32, #tpu.memory_space<vmem>>, vector<32x256xf32>
    tpu.vector_store %arg3[%c0_17, %c0_18], %34 {strides = array<i32>} : memref<32x256xf32, #tpu.memory_space<vmem>>, vector<32x256xf32>,
    return
  }
  func.func @transform_0(%arg0: i32) -> (i32, i32) {
    %c0_i32 = arith.constant 0 : i32
    %c0_i32_0 = arith.constant 0 : i32
    %c0_i32_1 = arith.constant 0 : i32
    return %c0_i32, %c0_i32_0 : i32, i32
  }
  func.func @transform_1(%arg0: i32) -> (i32, i32) {
    %c0_i32 = arith.constant 0 : i32
    %c0_i32_0 = arith.constant 0 : i32
    %c0_i32_1 = arith.constant 0 : i32
    return %c0_i32, %c0_i32_0 : i32, i32
  }
  func.func @transform_2(%arg0: i32) -> (i32, i32) {
    %c0_i32 = arith.constant 0 : i32
    %c0_i32_0 = arith.constant 0 : i32
    return %arg0, %c0_i32 : i32, i32
  }
}

</mosaic_0001>

<bundles_post_ra>
// kernel: pallas_stft.1
= control target key start
LH: loop header
LB: loop body
LE: loop exit
PB: predicated region body
PF: predicated region fallthrough
CT: control target
= control target key end

     0   :  { %s647_s9 = smov 0   ;;  %s815_s0 = inlined_call_operand.vmem [shape: f32[88,32], index: 0, kind: input, shape index: {}]   ;;  %s816_s1 = inlined_call_operand.vmem [shape: f32[128,256], index: 1, kind: input, shape index: {}]   ;;  %s817_s2 = inlined_call_operand.vmem [shape: f32[64,256], index: 2, kind: output, shape index: {}]  }
   0x1 LB: > { %s552_s10 = sadd.s32 4294967295, %s630_s9   ;;  %p555_p0 = scmp.ge.s32.totalorder %s630_s9, 1  ;;  %s630_s9 = sphi %s647_s9, %s12_s9  }
   0x2   : > { %p102_p1 = scmp.lt.s32.totalorder %s630_s9, 3 }
   0x4   : > { %p103_p2 = pnand %p555_p0, %p102_p1 }
   0x5   : > { %s559_s17 = sshll.u32 (!%p103_p2), %s552_s10, 5 }
   0x6   : > { %106 = sbr.rel (%p103_p2) target bundleno = 213 (0xd5), region = 28  ;;  %s696_s12 = scalar_lea.vmem (!%p103_p2), %s815_s0, %s559_s17 }
   0xb   : > { %v155_v0 = vld [vmem:[%s816_s1 + $0x70] sm:$0xff]  ;;  %v156_v1 = vld [vmem:[%s816_s1 + $0x78] sm:$0xff]  ;;  %v153_v4 = vld [vmem:[%s816_s1 + $0x60] sm:$0xff]  ;;  %vm157_vm0 = vcmask 261120  }
   0xc   : > { %v139_v2 = vld [vmem:[%s816_s1 + $0x30] sm:$0xff]  ;;  %182 = vmatpush.msra.mxu0 %v155_v0  ;;  %211 = vmatpush.msra.mxu1 %v156_v1  ;;  %v140_v3 = vld [vmem:[%s816_s1 + $0x38] sm:$0xff]  ;;  %v154_v5 = vld [vmem:[%s816_s1 + $0x68] sm:$0xff] }
   0xd   : > { %252 = vmatpush.msra.mxu2 %v139_v2  ;;  %281 = vmatpush.msra.mxu3 %v140_v3  ;;  %v137_v6 = vld [vmem:[%s816_s1 + $0x20] sm:$0xff]  ;;  %v138_v7 = vld [vmem:[%s816_s1 + $0x28] sm:$0xff]  ;;  %v151_v8 = vld [vmem:[%s816_s1 + $0x50] sm:$0xff] }
   0xe   : > { %183 = vmatpush.msra.mxu0 %v153_v4  ;;  %212 = vmatpush.msra.mxu1 %v154_v5  ;;  %v152_v9 = vld [vmem:[%s816_s1 + $0x58] sm:$0xff]  ;;  %v135_v10 = vld [vmem:[%s816_s1 + $0x10] sm:$0xff]  ;;  %v149_v12 = vld [vmem:[%s816_s1 + $0x40] sm:$0xff] }
   0xf   : > { %v136_v11 = vld [vmem:[%s816_s1 + $0x18] sm:$0xff]  ;;  %253 = vmatpush.msra.mxu2 %v137_v6  ;;  %282 = vmatpush.msra.mxu3 %v138_v7  ;;  %v150_v13 = vld [vmem:[%s816_s1 + $0x48] sm:$0xff]  ;;  %v133_v14 = vld [vmem:[%s816_s1] sm:$0xff] }
  0x10   : > { %184 = vmatpush.msra.mxu0 %v151_v8  ;;  %213 = vmatpush.msra.mxu1 %v152_v9  ;;  %v134_v15 = vld [vmem:[%s816_s1 + $0x8] sm:$0xff]  ;;  %v129_v17 = vld [vmem:[%s696_s12] sm:$0xff]  ;;  %v404_v18 = vld [vmem:[%s816_s1 + $0xf0] sm:$0xff] }
  0x11   : > { %254 = vmatpush.msra.mxu2 %v135_v10  ;;  %283 = vmatpush.msra.mxu3 %v136_v11  ;;  %v562_v16 = vld [vmem:[%s696_s12 + $0x8] sm:$0xff]  ;;  %v405_v19 = vld [vmem:[%s816_s1 + $0xf8] sm:$0xff]  ;;  %v311_v20 = vld [vmem:[%s816_s1 + $0xb0] sm:$0xff] }
  0x12   : > { %185 = vmatpush.msra.mxu0 %v149_v12  ;;  %214 = vmatpush.msra.mxu1 %v150_v13  ;;  %v312_v21 = vld [vmem:[%s816_s1 + $0xb8] sm:$0xff]  ;;  %v402_v22 = vld [vmem:[%s816_s1 + $0xe0] sm:$0xff]  ;;  %v403_v23 = vld [vmem:[%s816_s1 + $0xe8] sm:$0xff] }
  0x13   : > { %255 = vmatpush.msra.mxu2 %v133_v14  ;;  %284 = vmatpush.msra.mxu3 %v134_v15  ;;  %v309_v24 = vld [vmem:[%s816_s1 + $0xa0] sm:$0xff]  ;;  %v310_v25 = vld [vmem:[%s816_s1 + $0xa8] sm:$0xff]  ;;  %v400_v26 = vld [vmem:[%s816_s1 + $0xd0] sm:$0xff] }
  0x14   : > { %566 = vmatmul.msk.f32.vlgmr.msra.gmra.mxu0 %vm157_vm0, %v562_v16  ;;  %570 = vmatmul.msk.f32.vlgmr.msra.gmra.mxu1 %vm157_vm0, %v562_v16  ;;  %v401_v27 = vld [vmem:[%s816_s1 + $0xd8] sm:$0xff]  ;;  %v307_v28 = vld [vmem:[%s816_s1 + $0x90] sm:$0xff]  ;;  %v398_v31 = vld [vmem:[%s816_s1 + $0xc0] sm:$0xff] }
  0x15   : > { %574 = vmatmul.msk.f32.vlgmr.msra.gmra.mxu2 %vm157_vm0, %v129_v17  ;;  %578 = vmatmul.msk.f32.vlgmr.msra.gmra.mxu3 %vm157_vm0, %v129_v17  ;;  %v308_v29 = vld [vmem:[%s816_s1 + $0x98] sm:$0xff]  ;;  %v563_v30 = vld [vmem:[%s696_s12 + $0x10] sm:$0xff]  ;;  %v399_v32 = vld [vmem:[%s816_s1 + $0xc8] sm:$0xff] }
  0x16   : > { %430 = vmatpush.msrb.mxu2 %v404_v18  ;;  %459 = vmatpush.msrb.mxu3 %v405_v19  ;;  %v305_v33 = vld [vmem:[%s816_s1 + $0x80] sm:$0xff]  ;;  %v306_v34 = vld [vmem:[%s816_s1 + $0x88] sm:$0xff]  ;;  %v564_v35 = vld [vmem:[%s696_s12 + $0x18] sm:$0xff] }
  0x17   : > { %337 = vmatpush.msrb.mxu0 %v311_v20  ;;  %366 = vmatpush.msrb.mxu1 %v312_v21  ;;  %v565_v36 = vld [vmem:[%s696_s12 + $0x20] sm:$0xff]  ;;  %v600_v37 = vld [vmem:[%s696_s12 + $0x28] sm:$0xff]  ;;  %v601_v38 = vld [vmem:[%s696_s12 + $0x30] sm:$0xff]  ;;  %s556_s12 = sshll.u32 %s552_s10, 2 }
  0x18   : > { %431 = vmatpush.msrb.mxu2 %v402_v22  ;;  %460 = vmatpush.msrb.mxu3 %v403_v23  ;;  %p121_p3 = scmp.lt.s32.totalorder %s556_s12, 7 }
  0x19   : > { %338 = vmatpush.msrb.mxu0 %v309_v24  ;;  %367 = vmatpush.msrb.mxu1 %v310_v25 }
  0x1a   : > { %432 = vmatpush.msrb.mxu2 %v400_v26  ;;  %461 = vmatpush.msrb.mxu3 %v401_v27  ;;  %s819_s12 = smov (!%p121_p3, %s556_s12), 7 }
  0x1b   : > { %339 = vmatpush.msrb.mxu0 %v307_v28  ;;  %368 = vmatpush.msrb.mxu1 %v308_v29  ;;  %s612_s28 = sshll.u32 %s819_s12, 4 }
  0x1c   : > { %567 = vmatmul.msk.f32.gmra.mxu0 %vm157_vm0, %v563_v30  ;;  %571 = vmatmul.msk.f32.gmra.mxu1 %vm157_vm0, %v563_v30  ;;  %s802_s3 = scalar_lea.vmem %s817_s2, %s612_s28 }
  0x1d   : > { %575 = vmatmul.msk.f32.gmra.mxu2 %vm157_vm0, %v562_v16  ;;  %579 = vmatmul.msk.f32.gmra.mxu3 %vm157_vm0, %v562_v16 }
  0x1e   : > { %433 = vmatpush.msrb.mxu2 %v398_v31  ;;  %462 = vmatpush.msrb.mxu3 %v399_v32 }
  0x1f   : > { %340 = vmatpush.msrb.mxu0 %v305_v33  ;;  %369 = vmatpush.msrb.mxu1 %v306_v34 }
  0x24   : > { %568 = vmatmul.msk.f32.gmra.mxu0 %vm157_vm0, %v564_v35  ;;  %572 = vmatmul.msk.f32.gmra.mxu1 %vm157_vm0, %v564_v35 }
  0x25   : > { %576 = vmatmul.msk.f32.gmra.mxu2 %vm157_vm0, %v563_v30  ;;  %580 = vmatmul.msk.f32.gmra.mxu3 %vm157_vm0, %v563_v30 }
  0x2c   : > { %569 = vmatmul.msk.f32.gmra.mxu0 %vm157_vm0, %v565_v36  ;;  %573 = vmatmul.msk.f32.gmra.mxu1 %vm157_vm0, %v565_v36 }
  0x2d   : > { %577 = vmatmul.msk.f32.gmra.mxu2 %vm157_vm0, %v564_v35  ;;  %581 = vmatmul.msk.f32.gmra.mxu3 %vm157_vm0, %v564_v35 }
  0x34   : > { %588 = vmatmul.msk.f32.vlgmr.msrb.gmra.mxu0 %vm157_vm0, %v563_v30  ;;  %592 = vmatmul.msk.f32.vlgmr.msrb.gmra.mxu1 %vm157_vm0, %v563_v30 }
  0x35   : > { %602 = vmatmul.msk.f32.vlgmr.msrb.gmra.mxu2 %vm157_vm0, %v564_v35  ;;  %606 = vmatmul.msk.f32.vlgmr.msrb.gmra.mxu3 %vm157_vm0, %v564_v35 }
  0x3c   : > { %589 = vmatmul.msk.f32.gmra.mxu0 %vm157_vm0, %v564_v35  ;;  %593 = vmatmul.msk.f32.gmra.mxu1 %vm157_vm0, %v564_v35 }
  0x3d   : > { %603 = vmatmul.msk.f32.gmra.mxu2 %vm157_vm0, %v565_v36  ;;  %607 = vmatmul.msk.f32.gmra.mxu3 %vm157_vm0, %v565_v36 }
  0x44   : > { %590 = vmatmul.msk.f32.gmra.mxu0 %vm157_vm0, %v565_v36  ;;  %594 = vmatmul.msk.f32.gmra.mxu1 %vm157_vm0, %v565_v36 }
  0x45   : > { %604 = vmatmul.msk.f32.gmra.mxu2 %vm157_vm0, %v600_v37  ;;  %608 = vmatmul.msk.f32.gmra.mxu3 %vm157_vm0, %v600_v37 }
  0x4c   : > { %591 = vmatmul.msk.f32.gmra.mxu0 %vm157_vm0, %v600_v37  ;;  %595 = vmatmul.msk.f32.gmra.mxu1 %vm157_vm0, %v600_v37 }
  0x4d   : > { %605 = vmatmul.msk.f32.gmra.mxu2 %vm157_vm0, %v601_v38  ;;  %609 = vmatmul.msk.f32.gmra.mxu3 %vm157_vm0, %v601_v38 }
  0x91   : > { %v187_v39 = vpop.f32.mrf.mxu0  ;;  %v216_v40 = vpop.f32.mrf.mxu1 }
  0x98   : > { %v257_v41 = vpop.f32.mrf.mxu2  ;;  %v286_v42 = vpop.f32.mrf.mxu3 }
  0x99   : > { %v190_v43 = vpop.f32.mrf.mxu0  ;;  %v219_v44 = vpop.f32.mrf.mxu1  ;;  %v258_v57 = vadd.f32 %v257_v41, %v187_v39  ;;  %v287_v58 = vadd.f32 %v286_v42, %v216_v40 }
  0xa0   : > { %v260_v45 = vpop.f32.mrf.mxu2  ;;  %v289_v46 = vpop.f32.mrf.mxu3 }
  0xa1   : > { %v193_v47 = vpop.f32.mrf.mxu0  ;;  %v222_v48 = vpop.f32.mrf.mxu1  ;;  %v261_v3 = vadd.f32 %v260_v45, %v190_v43  ;;  %v290_v4 = vadd.f32 %v289_v46, %v219_v44 }
  0xa8   : > { %v263_v49 = vpop.f32.mrf.mxu2  ;;  %v292_v50 = vpop.f32.mrf.mxu3 }
  0xa9   : > { %v196_v51 = vpop.f32.mrf.mxu0  ;;  %v225_v52 = vpop.f32.mrf.mxu1  ;;  %v264_v13 = vadd.f32 %v263_v49, %v193_v47  ;;  %v293_v14 = vadd.f32 %v292_v50, %v222_v48 }
  0xb0   : > { %v266_v53 = vpop.f32.mrf.mxu2  ;;  %v295_v54 = vpop.f32.mrf.mxu3 }
  0xb1   : > { %v342_v55 = vpop.f32.mrf.mxu0  ;;  %v371_v56 = vpop.f32.mrf.mxu1  ;;  %v267_v23 = vadd.f32 %v266_v53, %v196_v51  ;;  %v296_v24 = vadd.f32 %v295_v54, %v225_v52 }
  0xb2   : > { %v383_v59 = vadd.f32 %v342_v55, %v258_v57  ;;  %v384_v60 = vadd.f32 %v371_v56, %v287_v58 }
  0xb8   : > { %v435_v61 = vpop.f32.mrf.mxu2  ;;  %v464_v62 = vpop.f32.mrf.mxu3 }
  0xb9   : > { %v476_v63 = vadd.f32 %v435_v61, %v383_v59  ;;  %v477_v0 = vadd.f32 %v464_v62, %v384_v60  ;;  %v345_v1 = vpop.f32.mrf.mxu0  ;;  %v374_v2 = vpop.f32.mrf.mxu1 }
  0xba   : > { %v385_v5 = vadd.f32 %v345_v1, %v261_v3  ;;  %v386_v6 = vadd.f32 %v374_v2, %v290_v4 }
  0xbb   : > { %484 = vst [vmem:[%s802_s3] sm:$0xff] %v476_v63 }
  0xbc   : > { %485 = vst [vmem:[%s802_s3 + $0x8] sm:$0xff] %v477_v0 }
  0xc0   : > { %v438_v7 = vpop.f32.mrf.mxu2  ;;  %v467_v8 = vpop.f32.mrf.mxu3 }
  0xc1   : > { %v478_v9 = vadd.f32 %v438_v7, %v385_v5  ;;  %v479_v10 = vadd.f32 %v467_v8, %v386_v6  ;;  %v348_v11 = vpop.f32.mrf.mxu0  ;;  %v377_v12 = vpop.f32.mrf.mxu1 }
  0xc2   : > { %v387_v15 = vadd.f32 %v348_v11, %v264_v13  ;;  %v388_v16 = vadd.f32 %v377_v12, %v293_v14 }
  0xc3   : > { %486 = vst [vmem:[%s802_s3 + $0x10] sm:$0xff] %v478_v9 }
  0xc4   : > { %487 = vst [vmem:[%s802_s3 + $0x18] sm:$0xff] %v479_v10 }
  0xc8   : > { %v441_v17 = vpop.f32.mrf.mxu2  ;;  %v470_v18 = vpop.f32.mrf.mxu3 }
  0xc9   : > { %v480_v19 = vadd.f32 %v441_v17, %v387_v15  ;;  %v481_v20 = vadd.f32 %v470_v18, %v388_v16  ;;  %v351_v21 = vpop.f32.mrf.mxu0  ;;  %v380_v22 = vpop.f32.mrf.mxu1 }
  0xca   : > { %v389_v25 = vadd.f32 %v351_v21, %v267_v23  ;;  %v390_v26 = vadd.f32 %v380_v22, %v296_v24 }
  0xcb   : > { %488 = vst [vmem:[%s802_s3 + $0x20] sm:$0xff] %v480_v19 }
  0xcc   : > { %489 = vst [vmem:[%s802_s3 + $0x28] sm:$0xff] %v481_v20 }
  0xd0   : > { %v444_v27 = vpop.f32.mrf.mxu2  ;;  %v473_v28 = vpop.f32.mrf.mxu3 }
  0xd1   : > { %v482_v29 = vadd.f32 %v444_v27, %v389_v25  ;;  %v483_v30 = vadd.f32 %v473_v28, %v390_v26 }
  0xd3   : > { %490 = vst [vmem:[%s802_s3 + $0x30] sm:$0xff] %v482_v29 }
  0xd4   : > { %491 = vst [vmem:[%s802_s3 + $0x38] sm:$0xff] %v483_v30 }
  0xd5 PF: > { %s12_s9 = sadd.s32 1, %s630_s9  }
  0xd6   : > { %p9_p4 = scmp.ge.s32.totalorder %s12_s9, 4  }
  0xd8   :  { %11 = sbr.rel (!%p9_p4) target bundleno = 1 (0x1), region = 59 }

</bundles_post_ra>
